<compile_context>
chip_gen: v7x
topology: tpu7x:2x2x1
jax: 0.10.0
libtpu: 0.0.40
codegen_flags: <defaults>
</compile_context>

<pallas_src>
import functools

import jax
import jax.numpy as jnp
from jax.experimental import pallas as pl
from jax.experimental.pallas import tpu as pltpu


def _vmem_budget_and_limit():
    """Budget for live kernel VMEM plus the scoped-VMEM limit, per generation.

    v5e/v6e have 128 MiB VMEM per TensorCore, v7x only 64 MiB, so the tile is
    sized from the real capacity rather than reusing a 128 MiB-part tile.
    """
    try:
        cap = int(pltpu.get_tpu_info().vmem_capacity_bytes)
    except Exception:  # conservative fallback: assume v7x-sized (64 MiB) VMEM
        cap = 64 * 1024 * 1024
    budget = min(int(cap * 0.68), 90 * 1024 * 1024)   # ~44 MiB (v7x), ~87 MiB (v5e/v6e)
    limit = int(min(cap - 6 * 1024 * 1024, budget + 24 * 1024 * 1024))
    return budget, limit


def _pick_spatial_tile(hw, c, x_itemsize, t_itemsize, budget_bytes, max_lanes=65536):
    """Spatial (lane) tile width sized on the TOTAL live VMEM footprint.

    Per lane (spatial position) of one tile we keep live:
      2x double-buffered x block    : 2 * C * x_itemsize
      2x double-buffered tgt block  : 2 * t_itemsize
      f32 accumulator scratch       : 4
      ~4 live (C, tile) f32 temps   : 4 * C * 4   (x_f32, x-m, exp, select)
      a few (1, tile) f32 rows      : 32
    """
    per_lane = 2 * c * x_itemsize + 2 * t_itemsize + 4 + 4 * c * 4 + 32
    t = budget_bytes // max(1, per_lane)
    t = max(256, min(max_lanes, int(t)))
    t = (t // 128) * 128
    if hw <= t:
        return hw  # single full-extent block (full dim => no 128-multiple rule)
    # Prefer a 128-multiple divisor of hw (kills the edge mask entirely) unless
    # it would shrink the DMA block by more than ~2x.
    for cand in range(t, max(127, t // 2 - 1), -128):
        if hw % cand == 0:
            return cand
    return t


def _ce2d_kernel(x_ref, t_ref, o_ref, acc_ref, *, hw, tile_hw, tiles_per_split,
                 any_mask):
    s = pl.program_id(2)

    @pl.when(s == 0)
    def _init():
        acc_ref[...] = jnp.zeros_like(acc_ref)

    x = x_ref[...].astype(jnp.float32)          # (C, TILE_HW): pixels on lanes
    t = t_ref[...].astype(jnp.int32)            # (1, TILE_HW): lane-dense targets

    # numerically-stable logsumexp over the class (sublane) axis
    m = jnp.max(x, axis=0, keepdims=True)                              # (1, T)
    lse = jnp.log(jnp.sum(jnp.exp(x - m), axis=0, keepdims=True))      # (1, T)

    # target-class logit per pixel: (C, 1) iota broadcast against the
    # lane-dense target row (no full (C, T) int32 iota materialized).
    cls_ids = jax.lax.broadcasted_iota(jnp.int32, (x.shape[0], 1), 0)  # (C, 1)
    picked = jnp.sum(jnp.where(cls_ids == t, x, 0.0),
                     axis=0, keepdims=True)                            # (1, T)

    # -log_softmax(x)[target] = (m + lse) - x[target]   (no logp tensor)
    loss = (m + lse) - picked                                          # (1, T)

    if any_mask:
        # Pay the edge mask only on tiles that actually over-cover H*W
        # (runtime gate; the bulk of tiles takes the unmasked fast path).
        gt = pl.program_id(0) * tiles_per_split + s        # global spatial tile
        needs_mask = (gt + 1) * tile_hw > hw

        @pl.when(needs_mask)
        def _masked():
            lane = jax.lax.broadcasted_iota(jnp.int32, loss.shape, 1)
            valid = (gt * tile_hw + lane) < hw
            # mask BEFORE accumulating: padded lanes may hold garbage/NaN
            acc_ref[...] += jnp.where(valid, loss, 0.0)

        @pl.when(jnp.logical_not(needs_mask))
        def _unmasked():
            acc_ref[...] += loss
    else:
        acc_ref[...] += loss

    @pl.when(s == pl.num_programs(2) - 1)
    def _finalize():
        # single cross-lane (XLU) reduction per (split, image)
        o_ref[...] = jnp.sum(acc_ref[...]).reshape(1, 1)


def cross_entropy_loss_2d(outputs, targets):
    """outputs: (N, C, H, W) float, targets: (N, H, W) int -> scalar f32 loss.

    Semantics: NLLLoss(log_softmax(outputs, dim=1), targets), mean reduction
    (the module's default weight=None, ignores_index=None configuration).
    TODO(synk): optional class `weight` / `ignore_index` paths of NLLLoss are
    not wired in; out-of-range targets (e.g. 255 / -100) are NOT ignored here.
    """
    N, C, H, W = outputs.shape
    HW = H * W

    # Free reshapes only: no transpose, no pad, no extra HBM dtype pass.
    x = outputs.reshape(N, C, HW)
    t = targets.reshape(N, 1, HW)
    if not (jnp.issubdtype(t.dtype, jnp.integer) and jnp.dtype(t.dtype).itemsize <= 4):
        t = t.astype(jnp.int32)  # only exotic (e.g. int64) targets pay a cast
    # narrow (u8/i16/i32) targets are DMA'd as-is and upcast in-kernel.

    vmem_budget, vmem_limit = _vmem_budget_and_limit()
    tile_hw = _pick_spatial_tile(HW, C, jnp.dtype(x.dtype).itemsize,
                                 jnp.dtype(t.dtype).itemsize, vmem_budget)
    s_tiles = pl.cdiv(HW, tile_hw)

    # Leading core-split axis over spatial halves keeps both v7x TensorCores
    # busy even for N == 1; it is size-1 (or serial and near-free) elsewhere.
    num_splits = 2 if s_tiles >= 2 else 1
    tiles_per_split = pl.cdiv(s_tiles, num_splits)
    over_cover = num_splits * tiles_per_split != s_tiles
    any_mask = over_cover or (HW % tile_hw != 0)
    last_block = s_tiles - 1

    # Clamp the (at most one) over-covering tile onto the previous block so the
    # pipeline issues no extra DMA; the in-kernel mask zeroes its contribution.
    def in_map(c, n, s):
        return (n, 0, jnp.minimum(c * tiles_per_split + s, last_block))

    kernel = functools.partial(
        _ce2d_kernel, hw=HW, tile_hw=tile_hw,
        tiles_per_split=tiles_per_split, any_mask=any_mask)

    partial_sums = pl.pallas_call(
        kernel,
        out_shape=jax.ShapeDtypeStruct((num_splits, N, 1, 1), jnp.float32),
        grid_spec=pltpu.PrefetchScalarGridSpec(
            num_scalar_prefetch=0,
            grid=(num_splits, N, tiles_per_split),
            in_specs=[
                # NOTE: pipeline_mode=pl.Buffered(3) on x was flagged as a
                # possible small v7x win; left at the default double-buffer.
                pl.BlockSpec((None, C, tile_hw), in_map),
                pl.BlockSpec((None, 1, tile_hw), in_map),
            ],
            out_specs=pl.BlockSpec((None, None, 1, 1),
                                   lambda c, n, s: (c, n, 0, 0)),
            scratch_shapes=[pltpu.VMEM((1, tile_hw), jnp.float32)],
        ),
        compiler_params=pltpu.CompilerParams(
            dimension_semantics=("parallel", "parallel", "arbitrary"),
            vmem_limit_bytes=vmem_limit,
        ),
    )(x, t)

    # mean over all N*H*W pixels
    return jnp.sum(partial_sums) / float(N * HW)


def _reference(outputs, targets):
    # pure-JAX reference: F.nll_loss(F.log_softmax(outputs, dim=1), targets)
    logp = jax.nn.log_softmax(outputs.astype(jnp.float32), axis=1)  # (N,C,H,W)
    picked = jnp.take_along_axis(
        logp, targets[:, None, :, :].astype(jnp.int32), axis=1)[:, 0]  # (N,H,W)
    return -jnp.mean(picked)


if __name__ == "__main__":
    N, C, H, W = 2, 4, 16, 16
    key = jax.random.PRNGKey(0)
    k1, k2 = jax.random.split(key)
    outputs = jax.random.normal(k1, (N, C, H, W), dtype=jnp.float32)
    targets = jax.random.randint(k2, (N, H, W), 0, C, dtype=jnp.int32)

    loss = jax.block_until_ready(cross_entropy_loss_2d(outputs, targets))
    ref = jax.block_until_ready(_reference(outputs, targets))
    assert jnp.allclose(loss, ref, atol=1e-5, rtol=1e-5), (loss, ref)
    print("KERNEL_OK")
</pallas_src>

<mosaic_0001>
module attributes {stable_mosaic.version = 11 : i64} {
  func.func @_ce2d_kernel(%arg0: i32, %arg1: i32, %arg2: i32, %arg3: memref<1x4x256xf32, #tpu.memory_space<vmem>>, %arg4: memref<1x1x256xi32, #tpu.memory_space<vmem>>, %arg5: memref<1x1x1x1xf32, #tpu.memory_space<vmem>>, %arg6: memref<1x256xf32, #tpu.memory_space<vmem>>) attributes {dimension_semantics = [#tpu.dimension_semantics<parallel>, #tpu.dimension_semantics<parallel>, #tpu.dimension_semantics<arbitrary>], iteration_bounds = array<i64: 1, 2, 1>, scalar_prefetch = 0 : i64, scratch_operands = 1 : i64, tpu.core_type = #tpu.core_type<tc>, window_params = [{transform_indices = @transform_0, window_bounds = array<i64: 1, 4, 256>}, {transform_indices = @transform_1, window_bounds = array<i64: 1, 1, 256>}, {transform_indices = @transform_2, window_bounds = array<i64: 1, 1, 1, 1>}]} {
    %c0_i32 = arith.constant 0 : i32
    %0 = arith.cmpi eq, %arg2, %c0_i32 : i32
    %1 = arith.extui %0 : i1 to i32
    %c0_i32_0 = arith.constant 0 : i32
    %2 = arith.cmpi ne, %1, %c0_i32_0 : i32
    scf.if %2 {
      %cst_15 = arith.constant 0.000000e+00 : f32
      %31 = vector.broadcast %cst_15 : f32 to vector<1x256xf32>
      %c0_16 = arith.constant 0 : index
      %c0_17 = arith.constant 0 : index
      %32 = vector.load %arg6[%c0_16, %c0_17] : memref<1x256xf32, #tpu.memory_space<vmem>>, vector<1x256xf32>
      tpu.vector_store %arg6[%c0_16, %c0_17], %31 {strides = array<i32>} : memref<1x256xf32, #tpu.memory_space<vmem>>, vector<1x256xf32>,
    } else {
    }
    %c0 = arith.constant 0 : index
    %c0_1 = arith.constant 0 : index
    %c0_2 = arith.constant 0 : index
    %3 = vector.load %arg3[%c0, %c0_1, %c0_2] : memref<1x4x256xf32, #tpu.memory_space<vmem>>, vector<1x4x256xf32>
    %4 = vector.shape_cast %3 : vector<1x4x256xf32> to vector<4x256xf32>
    %c0_3 = arith.constant 0 : index
    %c0_4 = arith.constant 0 : index
    %c0_5 = arith.constant 0 : index
    %5 = vector.load %arg4[%c0_3, %c0_4, %c0_5] : memref<1x1x256xi32, #tpu.memory_space<vmem>>, vector<1x1x256xi32>
    %6 = vector.shape_cast %5 : vector<1x1x256xi32> to vector<1x256xi32>
    %cst = arith.constant dense<0xFF800000> : vector<256xf32>
    %7 = vector.multi_reduction <maximumf>, %4, %cst [0] : vector<4x256xf32> to vector<256xf32>
    %8 = vector.shape_cast %7 : vector<256xf32> to vector<1x256xf32>
    %9 = vector.broadcast %8 : vector<1x256xf32> to vector<4x256xf32>
    %10 = arith.subf %4, %9 : vector<4x256xf32>
    %11 = math.exp %10 : vector<4x256xf32>
    %cst_6 = arith.constant dense<0.000000e+00> : vector<256xf32>
    %12 = vector.multi_reduction <add>, %11, %cst_6 [0] : vector<4x256xf32> to vector<256xf32>
    %13 = vector.shape_cast %12 : vector<256xf32> to vector<1x256xf32>
    %14 = math.log %13 : vector<1x256xf32>
    %15 = tpu.iota {dimensions = array<i32: 0>} : vector<4x1xi32>
    %16 = vector.broadcast %15 : vector<4x1xi32> to vector<4x256xi32>
    %17 = vector.broadcast %6 : vector<1x256xi32> to vector<4x256xi32>
    %18 = arith.cmpi eq, %16, %17 : vector<4x256xi32>
    %cst_7 = arith.constant 0.000000e+00 : f32
    %19 = vector.broadcast %cst_7 : f32 to vector<4x256xf32>
    %20 = arith.select %18, %4, %19 : vector<4x256xi1>, vector<4x256xf32>
    %cst_8 = arith.constant dense<0.000000e+00> : vector<256xf32>
    %21 = vector.multi_reduction <add>, %20, %cst_8 [0] : vector<4x256xf32> to vector<256xf32>
    %22 = vector.shape_cast %21 : vector<256xf32> to vector<1x256xf32>
    %23 = arith.addf %8, %14 : vector<1x256xf32>
    %24 = arith.subf %23, %22 : vector<1x256xf32>
    %c0_9 = arith.constant 0 : index
    %c0_10 = arith.constant 0 : index
    %25 = vector.load %arg6[%c0_9, %c0_10] : memref<1x256xf32, #tpu.memory_space<vmem>>, vector<1x256xf32>
    %26 = arith.addf %25, %24 : vector<1x256xf32>
    %c0_11 = arith.constant 0 : index
    %c0_12 = arith.constant 0 : index
    %27 = vector.load %arg6[%c0_11, %c0_12] : memref<1x256xf32, #tpu.memory_space<vmem>>, vector<1x256xf32>
    tpu.vector_store %arg6[%c0_11, %c0_12], %26 {strides = array<i32>} : memref<1x256xf32, #tpu.memory_space<vmem>>, vector<1x256xf32>,
    %c0_i32_13 = arith.constant 0 : i32
    %28 = arith.cmpi eq, %arg2, %c0_i32_13 : i32
    %29 = arith.extui %28 : i1 to i32
    %c0_i32_14 = arith.constant 0 : i32
    %30 = arith.cmpi ne, %29, %c0_i32_14 : i32
    scf.if %30 {
      %c0_15 = arith.constant 0 : index
      %c0_16 = arith.constant 0 : index
      %31 = vector.load %arg6[%c0_15, %c0_16] : memref<1x256xf32, #tpu.memory_space<vmem>>, vector<1x256xf32>
      %32 = vector.shape_cast %31 : vector<1x256xf32> to vector<1x1x256xf32>
      %cst_17 = arith.constant dense<0.000000e+00> : vector<1xf32>
      %33 = vector.multi_reduction <add>, %32, %cst_17 [1, 2] : vector<1x1x256xf32> to vector<1xf32>
      %34 = vector.shape_cast %33 : vector<1xf32> to vector<1x1x1xf32>
      %35 = vector.extract %34[0, 0, 0] : f32 from vector<1x1x1xf32>
      %36 = vector.broadcast %35 : f32 to vector<1x1xf32>
      %c0_18 = arith.constant 0 : index
      %c0_19 = arith.constant 0 : index
      %c0_20 = arith.constant 0 : index
      %c0_21 = arith.constant 0 : index
      %37 = vector.load %arg5[%c0_18, %c0_19, %c0_20, %c0_21] : memref<1x1x1x1xf32, #tpu.memory_space<vmem>>, vector<1x1x1x1xf32>
      %38 = vector.shape_cast %37 : vector<1x1x1x1xf32> to vector<1x1xf32>
      %39 = vector.shape_cast %36 : vector<1x1xf32> to vector<1x1x1x1xf32>
      tpu.vector_store %arg5[%c0_18, %c0_19, %c0_20, %c0_21], %39 {strides = array<i32>} : memref<1x1x1x1xf32, #tpu.memory_space<vmem>>, vector<1x1x1x1xf32>,
    } else {
    }
    return
  }
  func.func @transform_0(%arg0: i32, %arg1: i32, %arg2: i32) -> (i32, i32, i32) {
    %c1_i32 = arith.constant 1 : i32
    %0 = arith.muli %arg0, %c1_i32 : i32
    %1 = arith.addi %0, %arg2 : i32
    %c0_i32 = arith.constant 0 : i32
    %2 = arith.minsi %1, %c0_i32 : i32
    %c0_i32_0 = arith.constant 0 : i32
    %c0_i32_1 = arith.constant 0 : i32
    return %arg1, %c0_i32_0, %2 : i32, i32, i32
  }
  func.func @transform_1(%arg0: i32, %arg1: i32, %arg2: i32) -> (i32, i32, i32) {
    %c1_i32 = arith.constant 1 : i32
    %0 = arith.muli %arg0, %c1_i32 : i32
    %1 = arith.addi %0, %arg2 : i32
    %c0_i32 = arith.constant 0 : i32
    %2 = arith.minsi %1, %c0_i32 : i32
    %c0_i32_0 = arith.constant 0 : i32
    %c0_i32_1 = arith.constant 0 : i32
    return %arg1, %c0_i32_0, %2 : i32, i32, i32
  }
  func.func @transform_2(%arg0: i32, %arg1: i32, %arg2: i32) -> (i32, i32, i32, i32) {
    %c0_i32 = arith.constant 0 : i32
    %c0_i32_0 = arith.constant 0 : i32
    %c0_i32_1 = arith.constant 0 : i32
    return %arg0, %arg1, %c0_i32, %c0_i32_0 : i32, i32, i32, i32
  }
}

</mosaic_0001>

<bundles_post_ra>
// kernel: tpu_custom_call.1
= control target key start
LH: loop header
LB: loop body
LE: loop exit
PB: predicated region body
PF: predicated region fallthrough
CT: control target
= control target key end

     0   :  { %7 = vsyncpa [#allocation4], 0  ;;  %s929_s0 = inlined_call_operand.hbm [shape: f32[2,4,256], index: 0, kind: input, shape index: {}]   ;;  %s930_s1 = inlined_call_operand.hbm [shape: s32[2,1,256], index: 1, kind: input, shape index: {}]   ;;  %s931_s2 = inlined_call_operand.vmem [shape: f32[1,2,1,1], index: 2, kind: output, shape index: {}]  }
   0x1   :  { %9 = vsyncpa [#allocation4 + $0x1], 0 }
   0x2   :  { %10 = vsyncpa [#allocation6], 0 }
   0x3   :  { %12 = vsyncpa [#allocation6 + $0x1], 0  ;;  %s742_s9 = smov 0   ;;  %s744_s10 = smov 0  }
   0x4   :  { %s746_s11 = smov 0   ;;  %s748_s12 = smov 0  }
   0x5   :  { %s750_s13 = smov 0   ;;  %s752_s14 = smov 0  }
   0x6 LB: > { %s519_s15 = sadd.s32 4294967295, %s721_s14   ;;  %s33_s16 = sadd.s32 1, %s717_s13  ;;  %s721_s14 = sphi %s752_s14, %s18_s14   ;;  %s717_s13 = sphi %s750_s13, %s947_s13   ;;  %s713_s12 = sphi %s748_s12, %s946_s12   ;;  %s709_s11 = sphi %s746_s11, %s945_s11   ;;  %s705_s10 = sphi %s744_s10, %s944_s10   ;;  %s701_s9 = sphi %s742_s9, %s943_s9  }
   0x7   : > { %p35_p0 = scmp.ge.s32.totalorder %s33_s16, 2  ;;  %s52_s17 = sadd.s32 1, %s709_s11 }
   0x8   : > { %p59_p1 = scmp.ne.s32.totalorder %s709_s11, %s705_s10  ;;  %p60_p2 = scmp.eq.s32.totalorder %s721_s14, 0 }
   0x9   : > { %s949_s16 = smov (%p35_p0, %s33_s16), 0  ;;  %p65_p4 = scmp.ne.s32.totalorder %s705_s10, %s701_s9 }
   0xa   : > { %p778_p3 = por %p60_p2, %p59_p1  ;;  %s47_s19 = ssub.s32 %s717_s13, %s949_s16 }
   0xb   : > { %p66_p5 = scmp.eq.s32.totalorder %s519_s15, 0  ;;  %p50_p6 = scmp.eq.s32.totalorder %s47_s19, 0 }
   0xc   : > { %p549_p8 = scmp.lt.s32.totalorder %s721_s14, 2  ;;  %s794_s22 = sand.u32 1, %s709_s11  }
   0xd   : > { %p785_p7 = por %p66_p5, %p65_p4  ;;  %s534_s23 = sshll.u32 %s717_s13, 7 }
   0xe   : > { %s791_s21 = scalar_select %p50_p6, %s709_s11, %s52_s17  }
   0xf   : > { %s934_s20 = scalar_select %p785_p7, 1, 0 }
  0x10   : > { %s523_s24 = sshll.u32 %s794_s22, 3  ;;  %s801_s27 = scalar_lea.hbm %s929_s0, %s534_s23 }
  0x11   : > { %s155_s28 = scalar_lea.vmem [#allocation3], %s523_s24  ;;  %p805_p9 = pnand %p549_p8, %p778_p3 }
  0x12   : > { %s168_s29 = sshll.u32 %s155_s28, 4  ;;  %s152_s3 = scalar_lea.sflag [#allocation4], %s794_s22  ;;  %s809_s29 = int_to_ptr.vmem [resolvable:$true] %s168_s29 }
  0x13   : > { %s607_s4 = scalar_lea.hbm %s801_s27, 128  ;;  %p609_p13 = pneg %p805_p9 }
  0x14   : > { %p608_p12 = scmp.ne.s32.totalorder %s801_s27, %s607_s4  ;;  %s612_s7 = scalar_lea.hbm %s929_s0, 256 }
  0x15   : > { %p613_p2 = scmp.lt.u32.totalorder %s801_s27, %s929_s0  ;;  %p614_p3 = scmp.lt.u32.totalorder %s612_s7, %s607_s4 }
  0x16   : > { %p610_p0 = pnand %p609_p13, %p608_p12  ;;  %p616_p5 = scmp.lt.u32.totalorder %s607_s4, %s801_s27 }
  0x17   : > { %p615_p4 = por %p614_p3, %p613_p2 }
  0x18   : > { %p611_p1 = pneg %p610_p0 }
  0x19   : > { %p617_p6 = por %p616_p5, %p615_p4 }
  0x1b   : > { %p618_p8 = pnand %p617_p6, %p611_p1 }
  0x1d   : > { %621 = shalt.err (!%p618_p8)
}
  0x1e   : > { %s622_s15 = scalar_lea.vmem %s809_s29, 128  ;;  %s723_s17 = smov [#allocation3]  }
  0x1f   : > { %p623_p12 = scmp.ne.s32.totalorder %s809_s29, %s622_s15  ;;  %s627_s18 = sshll.u32 %s723_s17, 4  ;;  %s628_s18 = int_to_ptr.vmem [resolvable:$false] %s627_s18 }
  0x20   : > { %s629_s19 = scalar_lea.vmem %s628_s18, 256  ;;  %p630_p11 = scmp.lt.s32.totalorder %s809_s29, %s628_s18 }
  0x21   : > { %p625_p0 = pnand %p623_p12, %p609_p13  ;;  %p631_p2 = scmp.lt.s32.totalorder %s629_s19, %s622_s15 }
  0x23   : > { %p626_p10 = pneg %p625_p0  ;;  %p632_p3 = por %p631_p2, %p630_p11 }
  0x25   : > { %p633_p4 = pnand %p632_p3, %p626_p10 }
  0x27   : > { %636 = shalt.err (!%p633_p4)
}
  0x28   : > { %545 = dma.hbm_to_vmem [thread:$0]  (!%p805_p9), %s801_s27, 128, %s809_s29, %s152_s3  }
  0x29   : > { %p936_p1 = scmp.lt.s32.totalorder %s721_s14, 3  ;;  %p937_p5 = scmp.ge.s32.totalorder %s721_s14, 1 }
  0x2a   : > { %s526_s24 = sshll.u32 %s794_s22, 1  ;;  %s535_s25 = sshll.u32 %s717_s13, 5 }
  0x2b   : > { %p843_p6 = pnand %p937_p5, %p936_p1  ;;  %s852_s4 = scalar_lea.hbm %s930_s1, %s535_s25 }
  0x2c   : > { %s179_s5 = scalar_lea.vmem [#allocation5], %s526_s24  ;;  %s176_s27 = scalar_lea.sflag [#allocation6], %s794_s22 }
  0x2d   : > { %s938_s23 = scalar_select %p843_p6, 1, 0 }
  0x2e   : > { %s192_s6 = sshll.u32 %s179_s5, 4  ;;  %s637_s29 = scalar_lea.hbm %s852_s4, 32  ;;  %s193_s6 = int_to_ptr.vmem [resolvable:$true] %s192_s6 }
  0x2f   : > { %p638_p10 = scmp.ne.s32.totalorder %s852_s4, %s637_s29  ;;  %s642_s8 = scalar_lea.hbm %s930_s1, 64 }
  0x30   : > { %p643_p12 = scmp.lt.u32.totalorder %s852_s4, %s930_s1  ;;  %p644_p0 = scmp.lt.u32.totalorder %s642_s8, %s637_s29 }
  0x31   : > { %p640_p11 = pnand %p638_p10, %p609_p13  ;;  %p646_p3 = scmp.lt.u32.totalorder %s637_s29, %s852_s4 }
  0x32   : > { %p645_p2 = por %p644_p0, %p643_p12 }
  0x33   : > { %p641_p8 = pneg %p640_p11 }
  0x34   : > { %p647_p4 = por %p646_p3, %p645_p2 }
  0x36   : > { %p648_p1 = pnand %p647_p4, %p641_p8 }
  0x38   : > { %651 = shalt.err (!%p648_p1)
}
  0x39   : > { %s652_s22 = scalar_lea.vmem %s193_s6, 32  ;;  %s724_s17 = smov [#allocation5]  }
  0x3a   : > { %p653_p5 = scmp.ne.s32.totalorder %s193_s6, %s652_s22  ;;  %s657_s18 = sshll.u32 %s724_s17, 4  ;;  %s658_s18 = int_to_ptr.vmem [resolvable:$false] %s657_s18 }
  0x3b   : > { %s659_s19 = scalar_lea.vmem %s658_s18, 64  ;;  %p660_p7 = scmp.lt.s32.totalorder %s193_s6, %s658_s18 }
  0x3c   : > { %p655_p10 = pnand %p653_p5, %p609_p13  ;;  %p661_p6 = scmp.lt.s32.totalorder %s659_s19, %s652_s22 }
  0x3e   : > { %p656_p11 = pneg %p655_p10  ;;  %p662_p0 = por %p661_p6, %p660_p7 }
  0x40   : > { %p663_p12 = pnand %p662_p0, %p656_p11 }
  0x42   : > { %666 = shalt.err (!%p663_p12)
}
  0x43   : > { %548 = dma.hbm_to_vmem [thread:$0]  (!%p805_p9), %s852_s4, 32, %s193_s6, %s176_s27  }
  0x44   : > { %p939_p8 = scmp.ne.s32.totalorder %s938_s23, 0 }
  0x45   : > { %s203_s24 = sand.u32 (!%p939_p8), 1, %s705_s10   ;;  %p940_p13 = scmp.ne.s32.totalorder (!%p939_p8), %s934_s20, 0 }
  0x46   : > { %201 = sbr.rel (%p939_p8) target bundleno = 373 (0x175), region = 28  ;;  %s530_s25 = sshll.u32 (!%p939_p8), %s203_s24, 3 }
  0x47   : > { %s204_s26 = scalar_lea.sflag (!%p939_p8), [#allocation4], %s203_s24  ;;  %s207_s28 = scalar_lea.vmem (!%p939_p8), [#allocation3], %s530_s25 }
  0x4d   : > { %692 = dma.done.wait (%p940_p13), %s204_s26, 128  }
  0x4e   : > { %694 = vsyncadd (%p940_p13), %s204_s26, 4294967168  ;;  %s531_s5 = sshll.u32 %s203_s24, 1  ;;  %s213_s29 = scalar_lea.sflag [#allocation6], %s203_s24 }
  0x4f   : > { %s216_s30 = scalar_lea.vmem [#allocation5], %s531_s5 }
  0x50   : > { %696 = dma.done.wait (%p940_p13), %s213_s29, 32  }
  0x51   : > { %698 = vsyncadd (%p940_p13), %s213_s29, 4294967264  ;;  %v263_v0 = vlaneseq  ;;  %v725_v2 = vmov 0.0   ;;  %vm273_vm1 = vcmask 1043456   ;;  %v268_v3 = vld [vmem:[%s207_s28] sm:$0xff]  ;;  %v269_v24 = vld [vmem:[%s216_s30] sm:$0x3] }
  0x52   : > { %v271_v4 = vcombine.high %v268_v3, %v268_v3  ;;  %v274_v5 = vsel %vm273_vm1, %v268_v3, -inf  ;;  %v726_v58 = vmov 1966171168   ;;  %vm388_vm4 = vcmask 1040384   ;;  %p254_p7 = scmp.lt.s32.totalorder %s713_s12, 1 }
  0x53   : > { %vm885_vm0 = vcmp.lt.s32.totalorder %v263_v0, 256  ;;  %v275_v6 = vrot.slane %v274_v5, 4  ;;  %v893_v20 = vshrl.u32 %v263_v0, 7  ;;  %v353_v59 = vunpack.c.l.s4 %v726_v58 }
  0x54   : > { %267 = vst.msk [vmem:[#allocation2] sm:$0x3] %vm885_vm0, %v725_v2  ;;  %v281_v7 = vsel %vm273_vm1, %v271_v4, -inf  ;;  %s951_s12 = smov (!%p254_p7, %s713_s12), 1  ;;  %vm402_vm5 = vcmask 0  }
  0x55   : > { %v276_v8 = vmax.f32 %v274_v5, %v275_v6  ;;  %v282_v9 = vrot.slane %v281_v7, 4  ;;  %v320_v23 = vsub.s32 0, %v893_v20  ;;  %v324_v25 = vsub.s32 1, %v893_v20  ;;  %s258_s4 = scalar_lea.vmem %s931_s2, %s951_s12 }
  0x57   : > { %v277_v10 = vrot.slane %v276_v8, 2  ;;  %v283_v11 = vmax.f32 %v281_v7, %v282_v9  ;;  %v321_v26 = vrot.slane %v269_v24, %v320_v23  ;;  %v325_v27 = vrot.slane %v269_v24, %v324_v25 }
  0x59   : > { %v278_v12 = vmax.f32 %v276_v8, %v277_v10  ;;  %v284_v13 = vrot.slane %v283_v11, 2  ;;  %vm326_vm2 = vcmp.eq.s32.totalorder %v893_v20, %v321_v26  ;;  %vm327_vm3 = vcmp.eq.s32.totalorder %v893_v20, %v325_v27 }
  0x5a   : > { %v328_v28 = vsel %vm326_vm2, %v268_v3, 0.0  ;;  %v329_v32 = vsel %vm327_vm3, %v271_v4, 0.0  ;;  %v354_v4 = vunpack.c.0.s8 %v353_v59 }
  0x5b   : > { %v279_v14 = vrot.slane %v278_v12, 1  ;;  %v285_v15 = vmax.f32 %v283_v11, %v284_v13  ;;  %v330_v34 = vsel %vm273_vm1, %v328_v28, 0.0  ;;  %v337_v38 = vsel %vm273_vm1, %v329_v32, 0.0  ;;  %v348_v11 = vld [vmem:[#allocation2] sm:$0x3] }
  0x5c   : > { %v331_v39 = vrot.slane %v330_v34, 4  ;;  %v338_v42 = vrot.slane %v337_v38, 4  ;;  %v357_v8 = vsub.s32 %v354_v4, %v893_v20 }
  0x5d   : > { %v280_v16 = vmax.f32 %v278_v12, %v279_v14  ;;  %v286_v17 = vrot.slane %v285_v15, 1 }
  0x5e   : > { %v332_v45 = vadd.f32 %v331_v39, %v330_v34  ;;  %v339_v48 = vadd.f32 %v338_v42, %v337_v38 }
  0x5f   : > { %v287_v18 = vmax.f32 %v285_v15, %v286_v17 }
  0x60   : > { %v333_v51 = vrot.slane %v332_v45, 2  ;;  %v340_v53 = vrot.slane %v339_v48, 2 }
  0x61   : > { %v290_v19 = vcombine.low %v280_v16, %v287_v18 }
  0x62   : > { %v334_v54 = vadd.f32 %v333_v51, %v332_v45  ;;  %v341_v55 = vadd.f32 %v340_v53, %v339_v48 }
  0x63   : > { %v292_v21 = vsub.f32 %v268_v3, %v290_v19 }
  0x64   : > { %v335_v56 = vrot.slane %v334_v54, 1  ;;  %v342_v57 = vrot.slane %v341_v55, 1 }
  0x65   : > { %v293_v22 = vmul.f32 1.442695, %v292_v21 }
  0x66   : > { %v336_v62 = vadd.f32 %v335_v56, %v334_v54  ;;  %v343_v2 = vadd.f32 %v342_v57, %v341_v55 }
  0x67   : > { %601 = vpow2.f32 %v293_v22 }
  0x71   : > { %v602_v29 = vpop.eup %601 }
  0x72   : > { %v296_v30 = vcombine.high %v602_v29, %v602_v29  ;;  %v298_v31 = vsel %vm273_vm1, %v602_v29, 0.0 }
  0x73   : > { %v299_v33 = vrot.slane %v298_v31, 4 }
  0x74   : > { %v305_v35 = vsel %vm273_vm1, %v296_v30, 0.0 }
  0x75   : > { %v300_v36 = vadd.f32 %v299_v33, %v298_v31  ;;  %v306_v37 = vrot.slane %v305_v35, 4 }
  0x77   : > { %v301_v40 = vrot.slane %v300_v36, 2  ;;  %v307_v41 = vadd.f32 %v306_v37, %v305_v35 }
  0x79   : > { %v302_v43 = vadd.f32 %v301_v40, %v300_v36  ;;  %v308_v44 = vrot.slane %v307_v41, 2 }
  0x7b   : > { %v303_v46 = vrot.slane %v302_v43, 1  ;;  %v309_v47 = vadd.f32 %v308_v44, %v307_v41 }
  0x7d   : > { %v304_v49 = vadd.f32 %v303_v46, %v302_v43  ;;  %v310_v50 = vrot.slane %v309_v47, 1 }
  0x7f   : > { %v311_v52 = vadd.f32 %v310_v50, %v309_v47  ;;  %603 = vlog2.f32 %v304_v49 }
  0x81   : > { %605 = vlog2.f32 %v311_v52 }
  0x89   : > { %v604_v60 = vpop.eup %603 }
  0x8a   : > { %v313_v61 = vmul.f32 0.6931472, %v604_v60 }
  0x8b   : > { %v606_v63 = vpop.eup %605 }
  0x8c   : > { %v315_v0 = vmul.f32 0.6931472, %v606_v63  ;;  %v344_v3 = vadd.f32 %v313_v61, %v280_v16 }
  0x8e   : > { %v345_v5 = vadd.f32 %v315_v0, %v287_v18  ;;  %v346_v6 = vsub.f32 %v344_v3, %v336_v62 }
  0x90   : > { %v347_v7 = vsub.f32 %v345_v5, %v343_v2 }
  0x92   : > { %v351_v9 = vcombine.low %v346_v6, %v347_v7 }
  0x94   : > { %v358_v10 = vrot.slane %v351_v9, %v357_v8 }
  0x96   : > { %v365_v12 = vrot.slane %v358_v10, %v357_v8 }
  0x98   : > { %v367_v13 = vadd.f32 %v365_v12, %v348_v11 }
  0x9a   : > { %372 = vst.msk [vmem:[#allocation2] sm:$0x3] %vm885_vm0, %v367_v13 }
  0xa1   : > { %v376_v14 = vld [vmem:[#allocation2] sm:$0x3] }
  0xa2   : > { %v381_v15 = vrot.slane %v376_v14, %v320_v23  ;;  %v385_v16 = vrot.slane %v376_v14, %v324_v25 }
  0xa4   : > { %v389_v17 = vsel %vm388_vm4, %v381_v15, 0.0  ;;  %v390_v18 = vsel %vm388_vm4, %v385_v16, 0.0 }
  0xa5   : > { %v391_v19 = vadd.f32 %v390_v18, %v389_v17 }
  0xa7   : > { %392 = vadd.xlane.f32.xlu0 %v391_v19 }
 0x134   : > { %v393_v21 = vpop.xlane.xlu0 %392 }
 0x135   : > { %v394_v20 = vrot.slane %v393_v21, 4 }
 0x137   : > { %v395_v22 = vadd.f32 %v394_v20, %v393_v21 }
 0x139   : > { %v396_v24 = vrot.slane %v395_v22, 2 }
 0x13b   : > { %v397_v26 = vadd.f32 %v396_v24, %v395_v22 }
 0x13d   : > { %v398_v27 = vrot.slane %v397_v26, 1 }
 0x13f   : > { %v399_v28 = vadd.f32 %v398_v27, %v397_v26 }
 0x141   : > { %536 = vpush %v399_v28 }
 0x172   : > { %s537_s6 = spop %536 }
 0x173   : > { %v401_v1 = vstv %s537_s6 }
 0x174   : > { %403 = vst.msk [vmem:[%s258_s4] sm:$0x1] %vm402_vm5, %v401_v1 }
 0x175 PF: > { %s18_s14 = sadd.s32 1, %s721_s14   ;;  %s943_s9 = smov %s705_s10 }
 0x176   : > { %p15_p9 = scmp.ge.s32.totalorder %s18_s14, 4   ;;  %s944_s10 = smov %s709_s11 }
 0x177   : > { %s945_s11 = smov %s791_s21  ;;  %s946_s12 = smov %s717_s13 }
 0x178   : > { %s947_s13 = smov %s949_s16  ;;  %17 = sbr.rel (!%p15_p9) target bundleno = 6 (0x6), region = 89 }
 0x17f   :  { %429 = vsyncpa [#allocation4], 1 }
 0x180   :  { %431 = vsyncpa [#allocation4 + $0x1], 1 }
 0x181   :  { %432 = vsyncpa [#allocation6], 1 }
 0x182   :  { %434 = vsyncpa [#allocation6 + $0x1], 1 }

</bundles_post_ra>
